<compile_context>
chip_gen: v7x
topology: tpu7x:2x2x1
jax: 0.10.0
libtpu: 0.0.40
codegen_flags: <defaults>
</compile_context>

<pallas_src>
import jax
import jax.numpy as jnp
from jax import lax
from jax.experimental import pallas as pl
from jax.experimental.pallas import tpu as pltpu


def _round_up(n, m):
    return ((n + m - 1) // m) * m


def _cdiv(a, b):
    return (a + b - 1) // b


def _rbf_kernel(gamma_ref, x_ref, ct_ref, cn_ref, o_ref):
    # gamma_ref : (1,)     SMEM scalar-prefetch: gamma (f32)
    # x_ref     : (bb, F)  batch tile of inputs
    # ct_ref    : (F, Cp)  centers, transposed, native dtype (resident)
    # cn_ref    : (1, Cp)  gamma * ||c||^2, f32 (resident)
    # o_ref     : (bb, Cp) output tile
    x = x_ref[...]

    # x . c^T on the MXU with a native (K, N) RHS: contract x's last dim with
    # ct's first dim -> (bb, Cp), f32 accumulation.
    xc = lax.dot_general(
        x, ct_ref[...],
        dimension_numbers=(((1,), (0,)), ((), ())),
        preferred_element_type=jnp.float32,
    )

    g = gamma_ref[0]
    xf = x.astype(jnp.float32)
    xx = jnp.sum(xf * xf, axis=1, keepdims=True) * g            # gamma*||x||^2

    # exp(-gamma*||x - c||^2) = exp(2g*(x.c) - g*||x||^2 - g*||c||^2)
    # The 2g scale is a VALU mul that co-issues under the EUP exp.
    o_ref[...] = jnp.exp((2.0 * g) * xc - xx - cn_ref[...]).astype(o_ref.dtype)


def rbf_layer(x, centers, gamma, *, block_b=256):
    """Pallas RBF layer.  x: (B, F), centers: (C, F) -> (B, C)."""
    B, F = x.shape
    C, Fc = centers.shape
    assert F == Fc, "feature dims must match"

    x_itemsize = jnp.dtype(x.dtype).itemsize
    c_itemsize = jnp.dtype(centers.dtype).itemsize

    # --- one-time (parameter-only) precompute --------------------------------
    c32 = centers.astype(jnp.float32)
    cn = (gamma * jnp.sum(c32 * c32, axis=1))[None, :]           # (1, C) f32
    ct = jnp.transpose(centers, (1, 0))                          # (F, C) native

    # --- batch tile sizing ----------------------------------------------------
    # Sublane pack for x's dtype: 8 (f32), 16 (bf16), 32 (int8/fp8).
    pack = max(8, 32 // x_itemsize)

    n_tiles = _cdiv(B, block_b)
    # >= 2 grid steps when possible so v7x's 2 TensorCores both get work.
    if n_tiles == 1 and B >= 2 * pack:
        n_tiles = 2
    # Balanced tile size (minimizes tail padding), rounded to the sublane pack.
    bb = _round_up(_cdiv(B, n_tiles), pack)
    Bp = n_tiles * bb

    # Lane-dense output / center count.
    Cp = _round_up(C, 128)

    if Bp != B:
        x = jnp.pad(x, ((0, Bp - B), (0, 0)))
    if Cp != C:
        ct = jnp.pad(ct, ((0, 0), (0, Cp - C)))
        cn = jnp.pad(cn, ((0, 0), (0, Cp - C)))

    gamma_arr = jnp.asarray([gamma], dtype=jnp.float32)

    # --- VMEM budget (explicit, generation-safe) ------------------------------
    vmem_needed = (
        2 * bb * F * x_itemsize        # double-buffered x tiles
        + 1 * F * Cp * c_itemsize      # single-buffered centers (resident)
        + 1 * 8 * Cp * 4               # cn row padded to 8 sublanes, f32
        + 2 * bb * Cp * x_itemsize     # double-buffered output tiles
        + 2 * bb * Cp * 4              # f32 matmul result / exp temporaries
    )
    vmem_limit = int(min(max(2 * vmem_needed, 32 * 1024 * 1024),
                         64 * 1024 * 1024))

    cost = pl.CostEstimate(
        flops=2 * B * C * F + 4 * B * C,
        transcendentals=B * C,
        bytes_accessed=(B * F * x_itemsize + C * F * c_itemsize
                        + B * C * x_itemsize),
    )

    out = pl.pallas_call(
        _rbf_kernel,
        out_shape=jax.ShapeDtypeStruct((Bp, Cp), x.dtype),
        grid_spec=pltpu.PrefetchScalarGridSpec(
            num_scalar_prefetch=1,
            grid=(Bp // bb,),
            in_specs=[
                # x tile: streamed, double-buffered (default).
                pl.BlockSpec((bb, F), lambda i, g: (i, 0)),
                # centers (F, Cp): grid-invariant -> single buffer.
                pl.BlockSpec((F, Cp), lambda i, g: (0, 0),
                             pipeline_mode=pl.Buffered(1)),
                # gamma*||c||^2: grid-invariant -> single buffer.
                pl.BlockSpec((1, Cp), lambda i, g: (0, 0),
                             pipeline_mode=pl.Buffered(1)),
            ],
            out_specs=pl.BlockSpec((bb, Cp), lambda i, g: (i, 0)),
        ),
        compiler_params=pltpu.CompilerParams(
            dimension_semantics=("parallel",),
            vmem_limit_bytes=vmem_limit,
        ),
        cost_estimate=cost,
    )(gamma_arr, x, ct, cn)

    return out[:B, :C]


def rbf_reference(x, centers, gamma):
    # Mirrors torch: distances = norm(x[:,None,:] - c[None,:,:], dim=2)
    #                out = exp(-gamma * distances**2)
    diff = x[:, None, :].astype(jnp.float32) - centers[None, :, :].astype(jnp.float32)
    d2 = jnp.sum(diff * diff, axis=2)
    return jnp.exp(-gamma * d2)


if __name__ == "__main__":
    # Small shapes consistent with the module: in_features=32, num_centers=128.
    B, F, C = 16, 32, 128
    gamma = 0.5

    key = jax.random.PRNGKey(0)
    kx, kc = jax.random.split(key)
    x = jax.random.normal(kx, (B, F), dtype=jnp.float32)
    # nn.init.normal_(self.centers, 0, 1) -> standard normal init.
    centers = jax.random.normal(kc, (C, F), dtype=jnp.float32)

    out = rbf_layer(x, centers, gamma)
    out = jax.block_until_ready(out)

    ref = rbf_reference(x, centers, gamma)
    assert out.shape == (B, C)
    assert jnp.allclose(out, ref, atol=1e-5, rtol=1e-5), "mismatch vs reference"

    print("KERNEL_OK")
</pallas_src>

<mosaic_0001>
module attributes {stable_mosaic.version = 11 : i64} {
  func.func @_rbf_kernel(%arg0: i32, %arg1: memref<1xf32, #tpu.memory_space<smem>>, %arg2: memref<8x32xf32, #tpu.memory_space<vmem>>, %arg3: memref<32x128xf32, #tpu.memory_space<vmem>>, %arg4: memref<1x128xf32, #tpu.memory_space<vmem>>, %arg5: memref<8x128xf32, #tpu.memory_space<vmem>>) attributes {dimension_semantics = [#tpu.dimension_semantics<parallel>], iteration_bounds = array<i64: 2>, scalar_prefetch = 1 : i64, scratch_operands = 0 : i64, tpu.core_type = #tpu.core_type<tc>, window_params = [{transform_indices = @transform_0, window_bounds = array<i64: 8, 32>}, {pipeline_mode = #tpu.pipeline_mode<synchronous>, transform_indices = @transform_1, window_bounds = array<i64: 32, 128>}, {pipeline_mode = #tpu.pipeline_mode<synchronous>, transform_indices = @transform_2, window_bounds = array<i64: 1, 128>}, {transform_indices = @transform_3, window_bounds = array<i64: 8, 128>}]} {
    %c0 = arith.constant 0 : index
    %c0_0 = arith.constant 0 : index
    %0 = vector.load %arg2[%c0, %c0_0] : memref<8x32xf32, #tpu.memory_space<vmem>>, vector<8x32xf32>
    %c0_1 = arith.constant 0 : index
    %c0_2 = arith.constant 0 : index
    %1 = vector.load %arg3[%c0_1, %c0_2] : memref<32x128xf32, #tpu.memory_space<vmem>>, vector<32x128xf32>
    %cst = arith.constant dense<0.000000e+00> : vector<8x128xf32>
    %2 = tpu.matmul %0, %1, %cst {dimension_numbers = #tpu.dot_dimension_numbers<[1], [0], [0], [1], [0, 0, 1, 1], [], []>} : vector<8x32xf32>, vector<32x128xf32>, vector<8x128xf32> -> vector<8x128xf32>
    %c0_3 = arith.constant 0 : index
    %3 = memref.load %arg1[%c0_3] : memref<1xf32, #tpu.memory_space<smem>>
    %4 = arith.mulf %0, %0 : vector<8x32xf32>
    %cst_4 = arith.constant dense<0.000000e+00> : vector<8xf32>
    %5 = vector.multi_reduction <add>, %4, %cst_4 [1] : vector<8x32xf32> to vector<8xf32>
    %6 = vector.shape_cast %5 : vector<8xf32> to vector<8x1xf32>
    %7 = vector.broadcast %3 : f32 to vector<8x1xf32>
    %8 = arith.mulf %6, %7 : vector<8x1xf32>
    %cst_5 = arith.constant 2.000000e+00 : f32
    %9 = arith.mulf %cst_5, %3 : f32
    %10 = vector.broadcast %9 : f32 to vector<8x128xf32>
    %11 = arith.mulf %10, %2 : vector<8x128xf32>
    %12 = vector.broadcast %8 : vector<8x1xf32> to vector<8x128xf32>
    %13 = arith.subf %11, %12 : vector<8x128xf32>
    %c0_6 = arith.constant 0 : index
    %c0_7 = arith.constant 0 : index
    %14 = vector.load %arg4[%c0_6, %c0_7] : memref<1x128xf32, #tpu.memory_space<vmem>>, vector<1x128xf32>
    %15 = vector.broadcast %14 : vector<1x128xf32> to vector<8x128xf32>
    %16 = arith.subf %13, %15 : vector<8x128xf32>
    %17 = math.exp %16 : vector<8x128xf32>
    %c0_8 = arith.constant 0 : index
    %c0_9 = arith.constant 0 : index
    %18 = vector.load %arg5[%c0_8, %c0_9] : memref<8x128xf32, #tpu.memory_space<vmem>>, vector<8x128xf32>
    tpu.vector_store %arg5[%c0_8, %c0_9], %17 {strides = array<i32>} : memref<8x128xf32, #tpu.memory_space<vmem>>, vector<8x128xf32>,
    return
  }
  func.func @transform_0(%arg0: i32, %arg1: memref<1xf32, #tpu.memory_space<smem>>) -> (i32, i32) {
    %c0_i32 = arith.constant 0 : i32
    %c0_i32_0 = arith.constant 0 : i32
    return %arg0, %c0_i32 : i32, i32
  }
  func.func @transform_1(%arg0: i32, %arg1: memref<1xf32, #tpu.memory_space<smem>>) -> (i32, i32) {
    %c0_i32 = arith.constant 0 : i32
    %c0_i32_0 = arith.constant 0 : i32
    %c0_i32_1 = arith.constant 0 : i32
    return %c0_i32, %c0_i32_0 : i32, i32
  }
  func.func @transform_2(%arg0: i32, %arg1: memref<1xf32, #tpu.memory_space<smem>>) -> (i32, i32) {
    %c0_i32 = arith.constant 0 : i32
    %c0_i32_0 = arith.constant 0 : i32
    %c0_i32_1 = arith.constant 0 : i32
    return %c0_i32, %c0_i32_0 : i32, i32
  }
  func.func @transform_3(%arg0: i32, %arg1: memref<1xf32, #tpu.memory_space<smem>>) -> (i32, i32) {
    %c0_i32 = arith.constant 0 : i32
    %c0_i32_0 = arith.constant 0 : i32
    return %arg0, %c0_i32 : i32, i32
  }
}

</mosaic_0001>

<bundles_post_ra>
// kernel: tpu_custom_call.1
= control target key start
LH: loop header
LB: loop body
LE: loop exit
PB: predicated region body
PF: predicated region fallthrough
CT: control target
= control target key end

     0   :  { %s869_s0 = inlined_call_operand.<no memory space> [shape: f32[1], index: 0, kind: input, shape index: {}]   ;;  %s870_s1 = inlined_call_operand.hbm [shape: f32[16,32], index: 1, kind: input, shape index: {}]   ;;  %s871_s2 = inlined_call_operand.hbm [shape: f32[32,128], index: 2, kind: input, shape index: {}]   ;;  %s872_s3 = inlined_call_operand.vmem [shape: f32[1,128], index: 3, kind: input, shape index: {}]   ;;  %s873_s4 = inlined_call_operand.hbm [shape: f32[16,128], index: 4, kind: output, shape index: {}]  }
   0x1   :  { %9 = sst [smem:[#allocation3]] %s869_s0 }
   0x2   :  { %10 = vsyncpa [#allocation5], 0 }
   0x3   :  { %12 = vsyncpa [#allocation5 + $0x1], 0 }
   0x4   :  { %13 = vsyncpa [#allocation8], 0 }
   0x5   :  { %14 = vsyncpa [#allocation6], 0 }
   0x6   :  { %16 = vsyncpa [#allocation6 + $0x1], 0  ;;  %s666_s17 = smov 0   ;;  %s668_s18 = smov 0  }
   0x7   :  { %s670_s19 = smov 0   ;;  %s672_s20 = smov 0  }
   0x8 LB: > { %s687_s0 = sadd.s32 4294967295, %s628_s20   ;;  %s398_s21 = sadd.s32 4294967294, %s628_s20   ;;  %s628_s20 = sphi %s672_s20, %s893_s20   ;;  %s624_s19 = sphi %s670_s19, %s892_s19   ;;  %s620_s18 = sphi %s668_s18, %s891_s18   ;;  %s616_s17 = sphi %s666_s17, %s890_s17  }
   0x9   : > { %p42_p0 = scmp.ne.s32.totalorder %s620_s18, %s616_s17  ;;  %p874_p1 = scmp.eq.s32.totalorder %s687_s0, 0 }
   0xa   : > { %p114_p3 = scmp.eq.s32.totalorder %s398_s21, 1  ;;  %p399_p5 = scmp.ge.s32.totalorder %s628_s20, 1 }
   0xb   : > { %p696_p4 = por %p874_p1, %p42_p0  ;;  %p121_p7 = scmp.lt.s32.totalorder %s628_s20, 3 }
   0xc   : > { %p701_p6 = por %p114_p3, %p42_p0  ;;  %s630_s25 = smov [#allocation7]  }
   0xd   : > { %s877_s22 = scalar_select %p696_p4, 1, 0 }
   0xe   : > { %s878_s23 = scalar_select %p701_p6, 1, 0 }
   0xf   : > { %p706_p8 = pnand %p399_p5, %p121_p7  ;;  %s133_s26 = sshll.u32 %s630_s25, 4  ;;  %s710_s26 = int_to_ptr.vmem [resolvable:$true] %s133_s26 }
  0x10   : > { %s722_s28 = sadd.s32 1, %s628_s20   ;;  %s29_s29 = sadd.s32 1, %s624_s19 }
  0x11   : > { %s879_s24 = scalar_select %p706_p8, 1, 0 }
  0x12   : > { %p444_p9 = pneg %p706_p8  ;;  %s26_s30 = ssub.s32 %s628_s20, %s722_s28 }
  0x13   : > { %s500_s7 = scalar_lea.hbm %s871_s2, 512 }
  0x14   : > { %p717_p11 = pnand %p444_p9, %p874_p1  ;;  %p501_p12 = scmp.ne.s32.totalorder %s871_s2, %s500_s7 }
  0x15   : > { %p507_p5 = scmp.lt.u32.totalorder %s500_s7, %s871_s2 }
  0x16   : > { %p502_p13 = pneg %p717_p11 }
  0x18   : > { %p503_p0 = pnand %p502_p13, %p501_p12 }
  0x1a   : > { %p504_p3 = pneg %p503_p0 }
  0x1c   : > { %p509_p7 = pnand %p507_p5, %p504_p3 }
  0x1e   : > { %512 = shalt.err (!%p509_p7)
}
  0x1f   : > { %s513_s12 = scalar_lea.vmem %s710_s26, 512  ;;  %p521_p2 = scmp.lt.s32.totalorder %s710_s26, %s710_s26 }
  0x20   : > { %p514_p9 = scmp.ne.s32.totalorder %s710_s26, %s513_s12  ;;  %p522_p6 = scmp.lt.s32.totalorder %s513_s12, %s513_s12 }
  0x22   : > { %p516_p10 = pnand %p514_p9, %p502_p13  ;;  %p523_p4 = por %p522_p6, %p521_p2 }
  0x24   : > { %p517_p1 = pneg %p516_p10 }
  0x26   : > { %p524_p8 = pnand %p523_p4, %p517_p1 }
  0x28   : > { %527 = shalt.err (!%p524_p8)
}
  0x29   : > { %s631_s13 = smov 128   ;;  %s632_s14 = smov 8  }
  0x2a   : > { %447 = dma.hbm_to_vmem [thread:$0]  (!%p717_p11), %s871_s2, 512, %s710_s26, [#allocation8], %s631_s13, %s631_s13, %s632_s14  }
  0x2b   : > { %p27_p2 = scmp.eq.s32.totalorder %s26_s30, 0  ;;  %p36_p1 = scmp.ne.s32.totalorder %s624_s19, %s620_s18 }
  0x2c   : > { %p37_p4 = scmp.eq.s32.totalorder %s628_s20, 0  ;;  %p457_p6 = scmp.lt.s32.totalorder %s628_s20, 2 }
  0x2d   : > { %s753_s21 = scalar_select %p27_p2, %s624_s19, %s29_s29  }
  0x2e   : > { %p38_p8 = por %p37_p4, %p36_p1  ;;  %p881_p10 = scmp.eq.s32.totalorder %s687_s0, 1 }
  0x2f   : > { %s150_s5 = sand.u32 1, %s624_s19   ;;  %s403_s6 = sshll.u32 %s628_s20, 7 }
  0x30   : > { %p757_p12 = por %p881_p10, %p36_p1  ;;  %s402_s7 = sshll.u32 %s150_s5, 3 }
  0x31   : > { %s766_s9 = scalar_lea.hbm %s870_s1, %s403_s6  ;;  %s154_s26 = scalar_lea.vmem [#allocation4], %s402_s7 }
  0x32   : > { %s161_s29 = sshll.u32 %s154_s26, 4  ;;  %p768_p11 = pnand %p457_p6, %p38_p8  ;;  %s772_s29 = int_to_ptr.vmem [resolvable:$true] %s161_s29 }
  0x33   : > { %s151_s10 = scalar_lea.sflag [#allocation5], %s150_s5  ;;  %s528_s11 = scalar_lea.hbm %s766_s9, 128 }
  0x34   : > { %p529_p13 = scmp.ne.s32.totalorder %s766_s9, %s528_s11  ;;  %p530_p0 = pneg %p768_p11 }
  0x35   : > { %s533_s14 = scalar_lea.hbm %s870_s1, 256  ;;  %p534_p7 = scmp.lt.u32.totalorder %s766_s9, %s870_s1 }
  0x36   : > { %p531_p3 = pnand %p530_p0, %p529_p13  ;;  %p535_p9 = scmp.lt.u32.totalorder %s533_s14, %s528_s11 }
  0x37   : > { %p537_p1 = scmp.lt.u32.totalorder %s528_s11, %s766_s9 }
  0x38   : > { %p532_p5 = pneg %p531_p3  ;;  %p536_p2 = por %p535_p9, %p534_p7 }
  0x3a   : > { %p538_p4 = por %p537_p1, %p536_p2 }
  0x3c   : > { %p539_p6 = pnand %p538_p4, %p532_p5 }
  0x3e   : > { %542 = shalt.err (!%p539_p6)
}
  0x3f   : > { %s543_s5 = scalar_lea.vmem %s772_s29, 128  ;;  %s633_s6 = smov [#allocation4]  }
  0x40   : > { %p544_p8 = scmp.ne.s32.totalorder %s772_s29, %s543_s5  ;;  %s548_s7 = sshll.u32 %s633_s6, 4  ;;  %s549_s7 = int_to_ptr.vmem [resolvable:$false] %s548_s7 }
  0x41   : > { %s550_s27 = scalar_lea.vmem %s549_s7, 256  ;;  %p551_p3 = scmp.lt.s32.totalorder %s772_s29, %s549_s7 }
  0x42   : > { %p546_p10 = pnand %p544_p8, %p530_p0  ;;  %p552_p7 = scmp.lt.s32.totalorder %s550_s27, %s543_s5 }
  0x44   : > { %p547_p13 = pneg %p546_p10  ;;  %p553_p9 = por %p552_p7, %p551_p3 }
  0x46   : > { %p554_p2 = pnand %p553_p9, %p547_p13 }
  0x48   : > { %557 = shalt.err (!%p554_p2)
}
  0x49   : > { %451 = dma.hbm_to_vmem [thread:$0]  (!%p768_p11), %s766_s9, 128, %s772_s29, %s151_s10  }
  0x4a   : > { %p884_p5 = scmp.ne.s32.totalorder %s879_s24, 0 }
  0x4b   : > { %s802_s8 = sand.u32 (!%p884_p5), 1, %s620_s18   ;;  %p885_p0 = scmp.ne.s32.totalorder (!%p884_p5), %s877_s22, 0 }
  0x4c   : > { %170 = sbr.rel (%p884_p5) target bundleno = 342 (0x156), region = 32  ;;  %s405_s26 = sshll.u32 (!%p884_p5), %s802_s8, 3 }
  0x4d   : > { %s173_s11 = scalar_lea.sflag (!%p884_p5), [#allocation5], %s802_s8  ;;  %s176_s12 = scalar_lea.vmem (!%p884_p5), [#allocation4], %s405_s26 }
  0x53   : > { %603 = dma.done.wait (%p885_p0), %s173_s11, 128  }
  0x54   : > { %605 = vsyncadd (%p885_p0), %s173_s11, 4294967168  ;;  %p886_p11 = scmp.eq.s32.totalorder %s687_s0, 0 }
  0x56   : > { %607 = dma.done.wait (%p886_p11), [#allocation8], 512   ;;  %p887_p1 = pmov %p886_p11 }
  0x57   : > { %v634_v0 = vmov 0.0|0.0   ;;  %vm635_vm0 = vmmov 0   ;;  %v636_v1 = vmov 0.0   ;;  %v204_v2 = vld [vmem:[#allocation7] sm:$0xff]  ;;  %v205_v3 = vld [vmem:[#allocation7 + $0x8] sm:$0xff]  ;;  %v206_v4 = vld [vmem:[#allocation7 + $0x10] sm:$0xff] }
  0x58   : > { %609 = vsyncadd (%p887_p1), [#allocation8], 4294966784  ;;  %430 = vmatprep.subr.bf16.mxu0 %v634_v0  ;;  %427 = vmatprep.mubr.msk.f32.mxu0 %vm635_vm0, %v636_v1  ;;  %v431_v5 = vpack.c.bf16 %v205_v3, %v204_v2  ;;  %v207_v6 = vld [vmem:[#allocation7 + $0x18] sm:$0xff]  ;;  %vm208_vm1 = vcmask 261120   ;;  %s282_s22 = sld [smem:[#allocation3]]  ;;  %s411_s30 = sshll.u32 %s687_s0, 7 }
  0x59   : > { %v203_v7 = vld [vmem:[%s176_s12] sm:$0xff]  ;;  %v434_v9 = vpack.c.bf16 %v207_v6, %v206_v4  ;;  %s202_s10 = scalar_lea.vmem [#allocation9], %s405_s26  ;;  %s825_s16 = scalar_lea.hbm %s873_s4, %s411_s30 }
  0x5a   : > { %v283_v8 = vmul.f32 %v203_v7, %v203_v7  ;;  %432 = vmatpush3.bf16.msra.mxu0 %v431_v5  ;;  %v409_v18 = vld [vmem:[%s872_s3] ss:$0 sm:$0xff]  ;;  %s318_s13 = sshll.u32 %s202_s10, 4  ;;  %s305_s5 = scalar_lea.sflag [#allocation6], %s802_s8  ;;  %s827_s13 = int_to_ptr.vmem [resolvable:$true] %s318_s13 }
  0x5b   : > { %433 = vmatprep.subr.bf16.mxu0 %v634_v0  ;;  %s558_s6 = scalar_lea.vmem %s827_s13, 128  ;;  %s637_s0 = smov [#allocation9]  }
  0x5c   : > { %v284_v10 = vsel %vm208_vm1, %v283_v8, 0.0  ;;  %p559_p4 = scmp.ne.s32.totalorder %s827_s13, %s558_s6  ;;  %s562_s7 = sshll.u32 %s637_s0, 4  ;;  %s563_s7 = int_to_ptr.vmem [resolvable:$false] %s562_s7 }
  0x5d   : > { %285 = vadd.xlane.f32.xlu0 %v284_v10  ;;  %s564_s27 = scalar_lea.vmem %s563_s7, 256  ;;  %p565_p10 = scmp.lt.s32.totalorder %s827_s13, %s563_s7 }
  0x5e   : > { %435 = vmatpush3.bf16.msra.mxu0 %v434_v9  ;;  %s289_s24 = smul.f32 2.0, %s282_s22  ;;  %v287_v12 = vstv %s282_s22  ;;  %p560_p6 = pnand %p559_p4, %p757_p12 }
  0x5f   : > { %p566_p13 = scmp.lt.s32.totalorder %s564_s27, %s558_s6 }
  0x60   : > { %v290_v13 = vstv %s289_s24  ;;  %p561_p8 = pneg %p560_p6 }
  0x61   : > { %428 = vmatmul.mubr.msk.f32.vlgmr.msra.gmra.mrb[0].mxu0 %vm208_vm1, %v203_v7  ;;  %p567_p3 = por %p566_p13, %p565_p10 }
  0x63   : > { %p568_p7 = pnand %p567_p3, %p561_p8 }
  0xea   : > { %v286_v11 = vpop.xlane.xlu0 %285 }
  0xeb   : > { %v288_v14 = vmul.f32 %v287_v12, %v286_v11 }
 0x134   : > { %v278_v15 = vpop.f32.mrb[0].mxu0 }
 0x135   : > { %v291_v16 = vmul.f32 %v290_v13, %v278_v15  ;;  %v429_v17 = vpop.f32.mrb[1].mxu0 }
 0x137   : > { %v292_v19 = vsub.f32 %v291_v16, %v288_v14 }
 0x139   : > { %v300_v20 = vsub.f32 %v292_v19, %v409_v18 }
 0x13b   : > { %v301_v21 = vmul.f32 1.442695, %v300_v20 }
 0x13d   : > { %498 = vpow2.f32 %v301_v21 }
 0x147   : > { %v499_v22 = vpop.eup %498 }
 0x148   : > { %303 = vst [vmem:[%s202_s10] sm:$0xff] %v499_v22 }
 0x149   : > { %571 = shalt.err (!%p568_p7)
}
 0x14a   : > { %s572_s8 = scalar_lea.hbm %s825_s16, 128  ;;  %s576_s12 = scalar_lea.hbm %s873_s4, 256 }
 0x14b   : > { %p573_p9 = scmp.ne.s32.totalorder %s825_s16, %s572_s8  ;;  %p577_p0 = scmp.lt.u32.totalorder %s825_s16, %s873_s4 }
 0x14c   : > { %p578_p11 = scmp.lt.u32.totalorder %s576_s12, %s572_s8  ;;  %p580_p4 = scmp.lt.u32.totalorder %s572_s8, %s825_s16 }
 0x14d   : > { %p574_p2 = pnand %p573_p9, %p757_p12 }
 0x14e   : > { %p579_p1 = por %p578_p11, %p577_p0 }
 0x14f   : > { %p575_p5 = pneg %p574_p2 }
 0x150   : > { %p581_p6 = por %p580_p4, %p579_p1 }
 0x152   : > { %p582_p8 = pnand %p581_p6, %p575_p5 }
 0x154   : > { %585 = shalt.err (!%p582_p8)
}
 0x155   : > { %442 = dma.vmem_to_hbm [thread:$0]  (%p757_p12), %s827_s13, 128, %s825_s16, %s305_s5  }
 0x156 PF: > { %s330_s9 = sand.u32 1, %s616_s17   ;;  %p888_p10 = scmp.ne.s32.totalorder %s878_s23, 0 }
 0x157   : > { %p889_p13 = scmp.ge.s32.totalorder %s628_s20, 2  ;;  %s331_s29 = scalar_lea.sflag [#allocation6], %s330_s9 }
 0x159   : > { %p453_p3 = pnand %p889_p13, %p888_p10 }
 0x15b   : > { %611 = dma.done.wait (!%p453_p3), %s331_s29, 128  }
 0x15c   : > { %613 = vsyncadd (!%p453_p3), %s331_s29, 4294967168  ;;  %p19_p7 = scmp.ge.s32.totalorder %s722_s28, 4   ;;  %s890_s17 = smov %s620_s18 }
 0x15d   : > { %s891_s18 = smov %s624_s19  ;;  %s892_s19 = smov %s753_s21 }
 0x15e   : > { %s893_s20 = smov %s722_s28  ;;  %21 = sbr.rel (!%p19_p7) target bundleno = 8 (0x8), region = 81 }
 0x165   :  { %336 = vsyncpa [#allocation5], 1 }
 0x166   :  { %338 = vsyncpa [#allocation5 + $0x1], 1 }
 0x167   :  { %339 = vsyncpa [#allocation8], 1 }
 0x168   :  { %340 = vsyncpa [#allocation6], 1 }
 0x169   :  { %342 = vsyncpa [#allocation6 + $0x1], 1 }

</bundles_post_ra>
